<compile_context>
chip_gen: v5e
topology: v5e:2x2
jax: 0.10.0
libtpu: 0.0.40
codegen_flags: <defaults>
</compile_context>

<pallas_src>
import math

import jax
import jax.numpy as jnp
from jax.experimental import pallas as pl
from jax.experimental.pallas import tpu as pltpu


# ----------------------------------------------------------------------------
# Kernels
# ----------------------------------------------------------------------------
def _relu_layer_kernel_fast(x_ref, b_ref, w_ref, o_ref):
    """Fused relu((x - bias) @ W) when the whole K extent fits in one tile."""
    xb = x_ref[...] - b_ref[...]                       # (tm, k) - (1, k) broadcast
    acc = jnp.dot(xb, w_ref[...], preferred_element_type=jnp.float32)
    o_ref[...] = jnp.maximum(acc, 0.0).astype(o_ref.dtype)


def _relu_layer_kernel_acc(x_ref, b_ref, w_ref, o_ref, acc_ref):
    """Fused (x - bias) @ W + ReLU, accumulated over the K grid axis."""
    @pl.when(pl.program_id(2) == 0)
    def _init():
        acc_ref[...] = jnp.zeros_like(acc_ref)

    xb = x_ref[...] - b_ref[...]                       # (tm, tk) - (1, tk) broadcast
    acc_ref[...] += jnp.dot(xb, w_ref[...], preferred_element_type=jnp.float32)

    @pl.when(pl.program_id(2) == pl.num_programs(2) - 1)
    def _finalize():
        o_ref[...] = jnp.maximum(acc_ref[...], 0.0).astype(o_ref.dtype)


# ----------------------------------------------------------------------------
# Tiling helper + wrapper
# ----------------------------------------------------------------------------
def _pick_tile(dim, cap, align):
    """Largest legal block for `dim`: full extent when small (<= cap) or ragged,
    otherwise the biggest divisor of `dim` that is a multiple of `align`."""
    if dim <= cap:
        return dim
    t = (cap // align) * align
    while t >= align:
        if dim % t == 0:
            return t
        t -= align
    return dim  # ragged large dim: single full-extent block (legal per Pallas rules)


def relu_layer(x, weight, bias, *, tm_cap=1024, tn_cap=512, tk_cap=1024):
    """Pallas TPU implementation of ReLULayer.forward: relu((x - bias) @ weight)."""
    m, k = x.shape
    k2, n = weight.shape
    assert k == k2 and bias.shape == (k,), "shape mismatch"

    tm = _pick_tile(m, tm_cap, 8)      # sublane-aligned rows
    tn = _pick_tile(n, tn_cap, 128)    # lane-aligned output channels
    tk = _pick_tile(k, tk_cap, 128)    # lane-aligned reduction chunks

    bias2d = bias.reshape(1, k)
    vmem_limit = 48 * 1024 * 1024

    if tk == k:
        # ---- Fast path: no reduction grid axis, no scratch accumulator. ----
        grid = (m // tm, n // tn)
        return pl.pallas_call(
            _relu_layer_kernel_fast,
            out_shape=jax.ShapeDtypeStruct((m, n), x.dtype),
            grid_spec=pltpu.PrefetchScalarGridSpec(
                num_scalar_prefetch=0,
                grid=grid,
                in_specs=[
                    pl.BlockSpec((tm, k), lambda i, j: (i, 0)),    # x
                    pl.BlockSpec((1, k), lambda i, j: (0, 0)),     # bias (row vector)
                    pl.BlockSpec((k, tn), lambda i, j: (0, j)),    # weight
                ],
                out_specs=pl.BlockSpec((tm, tn), lambda i, j: (i, j)),
            ),
            compiler_params=pltpu.CompilerParams(
                dimension_semantics=("parallel", "parallel"),
                vmem_limit_bytes=vmem_limit,
            ),
        )(x, bias2d, weight)

    # ---- General path: split K, accumulate in fp32 VMEM scratch. ----
    grid = (m // tm, n // tn, k // tk)
    return pl.pallas_call(
        _relu_layer_kernel_acc,
        out_shape=jax.ShapeDtypeStruct((m, n), x.dtype),
        grid_spec=pltpu.PrefetchScalarGridSpec(
            num_scalar_prefetch=0,
            grid=grid,
            in_specs=[
                pl.BlockSpec((tm, tk), lambda i, j, kk: (i, kk)),   # x
                pl.BlockSpec((1, tk), lambda i, j, kk: (0, kk)),    # bias (row vector)
                pl.BlockSpec((tk, tn), lambda i, j, kk: (kk, j)),   # weight
            ],
            out_specs=pl.BlockSpec((tm, tn), lambda i, j, kk: (i, j)),
            scratch_shapes=[pltpu.VMEM((tm, tn), jnp.float32)],     # fp32 accumulator
        ),
        compiler_params=pltpu.CompilerParams(
            dimension_semantics=("parallel", "parallel", "arbitrary"),
            vmem_limit_bytes=vmem_limit,
        ),
    )(x, bias2d, weight)


# ----------------------------------------------------------------------------
# Parameter init mirroring the PyTorch module
#   weight: xavier_uniform_, bias: truncated_normal_(std=0.5)
# ----------------------------------------------------------------------------
def init_relu_layer_params(key, in_features, out_features):
    kw, kb = jax.random.split(key)
    bound = math.sqrt(6.0 / (in_features + out_features))
    weight = jax.random.uniform(kw, (in_features, out_features), jnp.float32,
                                minval=-bound, maxval=bound)
    bias = 0.5 * jax.random.truncated_normal(kb, -2.0, 2.0,
                                             (in_features,), jnp.float32)
    return weight, bias


# ----------------------------------------------------------------------------
if __name__ == "__main__":
    key = jax.random.PRNGKey(0)
    fwd = jax.jit(relu_layer)

    # (batch, in_features, out_features):
    #   - small primary case (fast path, full-extent blocks)
    #   - tiled case exercising the M grid axis (fast path, tm < m)
    #   - ragged case exercising full-extent ragged blocks
    #   - large-K case exercising the accumulator / K-reduction path
    cases = [(16, 32, 64), (1536, 512, 256), (300, 97, 50), (256, 2048, 256)]

    for batch, fin, fout in cases:
        key, kx, kp = jax.random.split(key, 3)
        x = jax.random.normal(kx, (batch, fin), jnp.float32)
        weight, bias = init_relu_layer_params(kp, fin, fout)

        out = fwd(x, weight, bias)
        out = jax.block_until_ready(out)

        ref = jnp.maximum(
            jnp.dot(x - bias, weight, precision=jax.lax.Precision.HIGHEST), 0.0)
        assert out.shape == (batch, fout)
        assert bool(jnp.allclose(out, ref, atol=1e-3, rtol=1e-3)), \
            f"mismatch for case {(batch, fin, fout)}"

    print("KERNEL_OK")
</pallas_src>

<mosaic_0001>
module attributes {stable_mosaic.version = 11 : i64} {
  func.func @_relu_layer_kernel_fast(%arg0: i32, %arg1: i32, %arg2: memref<16x32xf32, #tpu.memory_space<vmem>>, %arg3: memref<1x32xf32, #tpu.memory_space<vmem>>, %arg4: memref<32x64xf32, #tpu.memory_space<vmem>>, %arg5: memref<16x64xf32, #tpu.memory_space<vmem>>) attributes {dimension_semantics = [#tpu.dimension_semantics<parallel>, #tpu.dimension_semantics<parallel>], iteration_bounds = array<i64: 1, 1>, scalar_prefetch = 0 : i64, scratch_operands = 0 : i64, tpu.core_type = #tpu.core_type<tc>, window_params = [{transform_indices = @transform_0, window_bounds = array<i64: 16, 32>}, {pipeline_mode = #tpu.pipeline_mode<synchronous>, transform_indices = @transform_1, window_bounds = array<i64: 1, 32>}, {transform_indices = @transform_2, window_bounds = array<i64: 32, 64>}, {transform_indices = @transform_3, window_bounds = array<i64: 16, 64>}]} {
    %c0 = arith.constant 0 : index
    %c0_0 = arith.constant 0 : index
    %0 = vector.load %arg2[%c0, %c0_0] : memref<16x32xf32, #tpu.memory_space<vmem>>, vector<16x32xf32>
    %c0_1 = arith.constant 0 : index
    %c0_2 = arith.constant 0 : index
    %1 = vector.load %arg3[%c0_1, %c0_2] : memref<1x32xf32, #tpu.memory_space<vmem>>, vector<1x32xf32>
    %2 = vector.broadcast %1 : vector<1x32xf32> to vector<16x32xf32>
    %3 = arith.subf %0, %2 : vector<16x32xf32>
    %c0_3 = arith.constant 0 : index
    %c0_4 = arith.constant 0 : index
    %4 = vector.load %arg4[%c0_3, %c0_4] : memref<32x64xf32, #tpu.memory_space<vmem>>, vector<32x64xf32>
    %cst = arith.constant dense<0.000000e+00> : vector<16x64xf32>
    %5 = tpu.matmul %3, %4, %cst {dimension_numbers = #tpu.dot_dimension_numbers<[1], [0], [0], [1], [0, 0, 1, 1], [], []>} : vector<16x32xf32>, vector<32x64xf32>, vector<16x64xf32> -> vector<16x64xf32>
    %cst_5 = arith.constant 0.000000e+00 : f32
    %6 = vector.broadcast %cst_5 : f32 to vector<16x64xf32>
    %7 = arith.maximumf %5, %6 : vector<16x64xf32>
    %c0_6 = arith.constant 0 : index
    %c0_7 = arith.constant 0 : index
    %8 = vector.load %arg5[%c0_6, %c0_7] : memref<16x64xf32, #tpu.memory_space<vmem>>, vector<16x64xf32>
    tpu.vector_store %arg5[%c0_6, %c0_7], %7 {strides = array<i32>} : memref<16x64xf32, #tpu.memory_space<vmem>>, vector<16x64xf32>,
    return
  }
  func.func @transform_0(%arg0: i32, %arg1: i32) -> (i32, i32) {
    %c0_i32 = arith.constant 0 : i32
    %c0_i32_0 = arith.constant 0 : i32
    return %arg0, %c0_i32 : i32, i32
  }
  func.func @transform_1(%arg0: i32, %arg1: i32) -> (i32, i32) {
    %c0_i32 = arith.constant 0 : i32
    %c0_i32_0 = arith.constant 0 : i32
    %c0_i32_1 = arith.constant 0 : i32
    return %c0_i32, %c0_i32_0 : i32, i32
  }
  func.func @transform_2(%arg0: i32, %arg1: i32) -> (i32, i32) {
    %c0_i32 = arith.constant 0 : i32
    %c0_i32_0 = arith.constant 0 : i32
    return %c0_i32, %arg1 : i32, i32
  }
  func.func @transform_3(%arg0: i32, %arg1: i32) -> (i32, i32) {
    %c0_i32 = arith.constant 0 : i32
    return %arg0, %arg1 : i32, i32
  }
}

</mosaic_0001>

<bundles_post_ra>
// kernel: relu_layer.1
= control target key start
LH: loop header
LB: loop body
LE: loop exit
PB: predicated region body
PF: predicated region fallthrough
CT: control target
= control target key end

     0   :  { %8 = vsyncpa [#allocation3], 0  ;;  %s250_s0 = inlined_call_operand.hbm [shape: f32[16,32], index: 0, kind: input, shape index: {}]   ;;  %s251_s1 = inlined_call_operand.vmem [shape: f32[1,32], index: 1, kind: input, shape index: {}]   ;;  %s252_s2 = inlined_call_operand.hbm [shape: f32[32,64], index: 2, kind: input, shape index: {}]   ;;  %s253_s3 = inlined_call_operand.hbm [shape: f32[16,64], index: 3, kind: output, shape index: {}]  }
   0x1   :  { %9 = vsyncpa [#allocation6], 0 }
   0x2   :  { %10 = vsyncpa [#allocation4], 0  ;;  %s15_s14 = sshll.u32 %s250_s0, 4  ;;  %s204_s15 = smov [#allocation2]   ;;  %s16_s14 = int_to_ptr.hbm [resolvable:$true] %s15_s14 }
   0x3   :  { %s17_s16 = sshll.u32 %s204_s15, 4  ;;  %s30_s19 = sshll.u32 %s252_s2, 4  ;;  %s18_s16 = int_to_ptr.vmem [resolvable:$true] %s17_s16  ;;  %s31_s19 = int_to_ptr.hbm [resolvable:$true] %s30_s19 }
   0x4   :  { %s205_s20 = smov 128   ;;  %s206_s21 = smov 8  }
   0x5   :  { %23 = dma.hbm_to_vmem [thread:$0]  %s16_s14, 256, %s18_s16, [#allocation3], %s205_s20, %s205_s20, %s206_s21  }
   0x6   :  { %s207_s22 = smov [#allocation5]  }
   0x7   :  { %s32_s23 = sshll.u32 %s207_s22, 4  ;;  %s33_s23 = int_to_ptr.vmem [resolvable:$true] %s32_s23 }
   0x8   :  { %38 = dma.hbm_to_vmem [thread:$0]  %s31_s19, 512, %s33_s23, [#allocation6], %s205_s20, %s205_s20, %s206_s21  }
   0x9   :  { %198 = dma.done.wait [#allocation3], 256  }
   0xa   :  { %199 = vsyncadd [#allocation3], 4294967040 }
   0xb   :  { %200 = dma.done.wait [#allocation6], 512  }
   0xc   :  { %201 = vsyncadd [#allocation6], 4294966784  ;;  %v58_v0 = vld [vmem:[#allocation5 + $0x18] sm:$0xff]  ;;  %v57_v1 = vld [vmem:[#allocation5 + $0x10] sm:$0xff]  ;;  %vm59_vm0 = vcmask 261120   ;;  %s208_s24 = smov [#allocation7]  }
   0xd   :  { %78 = vmatpush.msra.mxu0 %v58_v0  ;;  %116 = vmatpush.msra.mxu1 %v58_v0  ;;  %v47_v2 = vld [vmem:[#allocation2] sm:$0xff]  ;;  %v56_v3 = vld [vmem:[#allocation5 + $0x8] sm:$0xff]  ;;  %v48_v5 = vld [vmem:[#allocation2 + $0x8] sm:$0xff]  ;;  %s98_s25 = sshll.u32 %s208_s24, 4  ;;  %s100_s28 = sshll.u32 %s253_s3, 4  ;;  %vm91_vm1 = vcmask 523264   ;;  %s99_s25 = int_to_ptr.vmem [resolvable:$true] %s98_s25  ;;  %s101_s28 = int_to_ptr.hbm [resolvable:$true] %s100_s28 }
   0xe   :  { %v125_v4 = vld [vmem:[%s251_s1] ss:$0 sm:$0xff]  ;;  %v55_v6 = vld [vmem:[#allocation5] sm:$0xff] }
   0xf   :  { %79 = vmatpush.msra.mxu0 %v57_v1  ;;  %117 = vmatpush.msra.mxu1 %v57_v1  ;;  %v53_v7 = vsub.f32 %v47_v2, %v125_v4  ;;  %v54_v8 = vsub.f32 %v48_v5, %v125_v4 }
  0x11   :  { %80 = vmatpush.msra.mxu0 %v56_v3  ;;  %118 = vmatpush.msra.mxu1 %v56_v3 }
  0x13   :  { %81 = vmatpush.msra.mxu0 %v55_v6  ;;  %119 = vmatpush.msra.mxu1 %v55_v6 }
  0x14   :  { %114 = vmatmul.msk.f32.vlgmr.msra.gmra.mxu0 %vm59_vm0, %v53_v7  ;;  %115 = vmatmul.msk.f32.vlgmr.msra.gmra.mxu1 %vm59_vm0, %v54_v8 }
  0x91   :  { %v83_v9 = vpop.f32.mrf.mxu0  ;;  %v86_v10 = vpop.f32.mrf.mxu1 }
  0x92   :  { %v89_v11 = vmax.f32 %v83_v9, 0.0  ;;  %v90_v12 = vmax.f32 %v86_v10, 0.0 }
  0x94   :  { %92 = vst.msk [vmem:[#allocation7] sm:$0xff] %vm91_vm1, %v89_v11 }
  0x95   :  { %93 = vst.msk [vmem:[#allocation7 + $0x8] sm:$0xff] %vm91_vm1, %v90_v12 }
  0x96   :  { %106 = dma.vmem_to_hbm [thread:$0]  %s99_s25, 256, %s101_s28, [#allocation4], %s205_s20, %s205_s20, %s206_s21  }
  0x97   :  { %202 = dma.done.wait [#allocation4], 256  }
  0x98   :  { %203 = vsyncadd [#allocation4], 4294967040 }
  0x99   :  { %111 = vsyncpa [#allocation3], 1 }
  0x9a   :  { %112 = vsyncpa [#allocation6], 1 }
  0x9b   :  { %113 = vsyncpa [#allocation4], 1 }

</bundles_post_ra>
